<compile_context>
chip_gen: v7x
topology: tpu7x:2x2x1
jax: 0.10.0
libtpu: 0.0.40
codegen_flags: <defaults>
</compile_context>

<pallas_src>
import jax
import jax.numpy as jnp
import numpy as np
from jax.experimental import pallas as pl
from jax.experimental.pallas import tpu as pltpu

# Small synthetic shapes consistent with the module:
B, C, H, W = 2, 4, 16, 16          # image: (B, C, H, W)  (NCHW, PyTorch convention)
KH = KW = 3                        # conv kernel
EMB = 32                           # embedding_dim == fc.in_features
NUM_CLASSES = 10                   # fc.out_features
HW = H * W
N = B * HW                         # 512 — lane axis of the conv activation
K = C * KH * KW                    # 36  — im2col contraction dim
OUT_PAD = 128                      # packed [logits | emb | pad] output width (lane-dense)


def _wrapper_kernel(p_ref, wc_ref, bc_ref, pool_ref, wo_ref, bo_ref, out_ref):
    # p_ref   : (K, N)         bf16 im2col patches, lane-dense (N = B*H*W)
    # wc_ref  : (EMB, K)       bf16 conv weight as matmul operand
    # bc_ref  : (EMB, 1)       f32  conv bias (column -> broadcasts along lanes)
    # pool_ref: (B, N)         f32  per-sample mean matrix (1/HW inside own segment)
    # wo_ref  : (EMB, OUT_PAD) f32  fused [fc_weight.T | I_EMB | 0] output projection
    # bo_ref  : (1, OUT_PAD)   f32  fused [fc_bias | 0]
    # out_ref : (B, OUT_PAD)   f32  packed [logits | embedding | 0] slab
    act = jnp.dot(wc_ref[...], p_ref[...],
                  preferred_element_type=jnp.float32)            # (EMB, N) on the MXU
    act = jnp.maximum(act + bc_ref[...], 0.0)                    # bias + ReLU, dense vregs
    emb = jnp.einsum("bn,en->be", pool_ref[...], act,            # global avg pool on the MXU
                     preferred_element_type=jnp.float32)         # (B, EMB)
    out_ref[...] = (jnp.dot(emb, wo_ref[...],
                            preferred_element_type=jnp.float32)
                    + bo_ref[...])                               # one dense (B, 128) store


@jax.jit
def model_wrapper_forward(image_nchw, w_conv, b_conv, w_fc, b_fc):
    """Returns (logits (B, NUM_CLASSES), embeddings (B, EMB)), matching
    ModelWrapper.forward's (self._fc(emb.squeeze()), emb.squeeze())."""
    # ---- im2col as one XLA op; "CNHW" out-spec -> (C*KH*KW, B, H, W). Channel-major
    #      (c, ky, kx) patch ordering matches the OIHW conv-weight flatten. ----
    patches = jax.lax.conv_general_dilated_patches(
        image_nchw, (KH, KW), (1, 1), ((1, 1), (1, 1)),
        dimension_numbers=("NCHW", "OIHW", "CNHW"))              # (K, B, H, W)
    patches_kn = patches.reshape(K, N).astype(jnp.bfloat16)      # (K, B*HW), lane-dense

    w_conv_mat = w_conv.reshape(EMB, K).astype(jnp.bfloat16)     # (EMB, K)
    b_conv_col = b_conv.reshape(EMB, 1).astype(jnp.float32)      # (EMB, 1)

    # Segment-mean matrix: emb[b] = (1/HW) * sum over columns of sample b.
    pool_mat = jnp.asarray(
        np.kron(np.eye(B, dtype=np.float32),
                np.full((1, HW), 1.0 / HW, np.float32)))         # (B, N)

    # Fused output projection: fc columns, then an exact identity copy of the embedding.
    pad_cols = OUT_PAD - NUM_CLASSES - EMB
    w_comb = jnp.concatenate(
        [w_fc.T.astype(jnp.float32),
         jnp.eye(EMB, dtype=jnp.float32),
         jnp.zeros((EMB, pad_cols), jnp.float32)], axis=1)       # (EMB, OUT_PAD)
    b_comb = jnp.concatenate(
        [b_fc.astype(jnp.float32),
         jnp.zeros((OUT_PAD - NUM_CLASSES,), jnp.float32)])[None, :]   # (1, OUT_PAD)

    flops = 2 * EMB * K * N + 2 * B * N * EMB + 2 * B * EMB * OUT_PAD
    bytes_accessed = (patches_kn.size * 2 + w_conv_mat.size * 2 + b_conv_col.size * 4
                      + pool_mat.size * 4 + w_comb.size * 4 + b_comb.size * 4
                      + B * OUT_PAD * 4)

    out = pl.pallas_call(
        _wrapper_kernel,
        out_shape=jax.ShapeDtypeStruct((B, OUT_PAD), jnp.float32),
        in_specs=[pl.BlockSpec(memory_space=pltpu.MemorySpace.VMEM)] * 6,
        out_specs=pl.BlockSpec(memory_space=pltpu.MemorySpace.VMEM),
        cost_estimate=pl.CostEstimate(flops=flops, transcendentals=0,
                                      bytes_accessed=bytes_accessed),
    )(patches_kn, w_conv_mat, b_conv_col, pool_mat, w_comb, b_comb)

    logits = out[:, :NUM_CLASSES]
    emb = out[:, NUM_CLASSES:NUM_CLASSES + EMB]
    return logits, emb


def reference_forward(image_nchw, w_conv, b_conv, w_fc, b_fc):
    # Pure-JAX f32 reference (mirrors PyTorch: Conv2d(pad=1) -> ReLU -> AdaptiveAvgPool2d(1)
    # -> squeeze -> Linear).
    conv = jax.lax.conv_general_dilated(
        image_nchw, w_conv, window_strides=(1, 1), padding=((1, 1), (1, 1)),
        dimension_numbers=("NCHW", "OIHW", "NCHW"))
    conv = conv + b_conv[None, :, None, None]
    act = jnp.maximum(conv, 0.0)
    emb = jnp.mean(act, axis=(2, 3))                              # (B, EMB) == squeeze of (B, EMB, 1, 1)
    logits = emb @ w_fc.T + b_fc
    return logits, emb


if __name__ == "__main__":
    key = jax.random.PRNGKey(0)
    k_img, k_wc, k_bc, k_wf, k_bf = jax.random.split(key, 5)

    # Deterministic synthetic parameters (no checkpoint load).
    image = jax.random.normal(k_img, (B, C, H, W), dtype=jnp.float32)
    w_conv = jax.random.normal(k_wc, (EMB, C, KH, KW), jnp.float32) * 0.1   # Conv2d weight (OIHW)
    b_conv = jax.random.normal(k_bc, (EMB,), jnp.float32) * 0.1
    w_fc = jax.random.normal(k_wf, (NUM_CLASSES, EMB), jnp.float32) * 0.1   # Linear weight (out, in)
    b_fc = jax.random.normal(k_bf, (NUM_CLASSES,), jnp.float32) * 0.1

    logits, emb = model_wrapper_forward(image, w_conv, b_conv, w_fc, b_fc)
    jax.block_until_ready((logits, emb))

    ref_logits, ref_emb = reference_forward(image, w_conv, b_conv, w_fc, b_fc)
    assert np.allclose(np.asarray(logits), np.asarray(ref_logits), rtol=1e-2, atol=1e-2)
    assert np.allclose(np.asarray(emb), np.asarray(ref_emb), rtol=1e-2, atol=1e-2)

    print("KERNEL_OK")
</pallas_src>

<mosaic_0001>
module attributes {stable_mosaic.version = 11 : i64} {
  func.func @_wrapper_kernel(%arg0: memref<36x512xbf16, #tpu.memory_space<vmem>>, %arg1: memref<32x36xbf16, #tpu.memory_space<vmem>>, %arg2: memref<32x1xf32, #tpu.memory_space<vmem>>, %arg3: memref<2x512xf32, #tpu.memory_space<vmem>>, %arg4: memref<32x128xf32, #tpu.memory_space<vmem>>, %arg5: memref<1x128xf32, #tpu.memory_space<vmem>>, %arg6: memref<2x128xf32, #tpu.memory_space<vmem>>) attributes {dimension_semantics = [], scalar_prefetch = 0 : i64, scratch_operands = 0 : i64, tpu.core_type = #tpu.core_type<tc>} {
    %c0 = arith.constant 0 : index
    %c0_0 = arith.constant 0 : index
    %0 = vector.load %arg1[%c0, %c0_0] : memref<32x36xbf16, #tpu.memory_space<vmem>>, vector<32x36xbf16>
    %c0_1 = arith.constant 0 : index
    %c0_2 = arith.constant 0 : index
    %1 = vector.load %arg0[%c0_1, %c0_2] : memref<36x512xbf16, #tpu.memory_space<vmem>>, vector<36x512xbf16>
    %cst = arith.constant dense<0.000000e+00> : vector<32x512xf32>
    %2 = tpu.matmul %0, %1, %cst {dimension_numbers = #tpu.dot_dimension_numbers<[1], [0], [0], [1], [0, 0, 1, 1], [], []>} : vector<32x36xbf16>, vector<36x512xbf16>, vector<32x512xf32> -> vector<32x512xf32>
    %c0_3 = arith.constant 0 : index
    %c0_4 = arith.constant 0 : index
    %3 = vector.load %arg2[%c0_3, %c0_4] : memref<32x1xf32, #tpu.memory_space<vmem>>, vector<32x1xf32>
    %4 = vector.broadcast %3 : vector<32x1xf32> to vector<32x512xf32>
    %5 = arith.addf %2, %4 : vector<32x512xf32>
    %cst_5 = arith.constant 0.000000e+00 : f32
    %6 = vector.broadcast %cst_5 : f32 to vector<32x512xf32>
    %7 = arith.maximumf %5, %6 : vector<32x512xf32>
    %c0_6 = arith.constant 0 : index
    %c0_7 = arith.constant 0 : index
    %8 = vector.load %arg3[%c0_6, %c0_7] : memref<2x512xf32, #tpu.memory_space<vmem>>, vector<2x512xf32>
    "tpu.trace_start"() <{level = 10 : i32, message = "bn,en->be"}> : () -> ()
    %cst_8 = arith.constant dense<0.000000e+00> : vector<2x32xf32>
    %9 = tpu.matmul %8, %7, %cst_8 {dimension_numbers = #tpu.dot_dimension_numbers<[1], [1], [0], [0], [0, 0, 1, 0], [], []>} : vector<2x512xf32>, vector<32x512xf32>, vector<2x32xf32> -> vector<2x32xf32>
    "tpu.trace_stop"() : () -> ()
    %c0_9 = arith.constant 0 : index
    %c0_10 = arith.constant 0 : index
    %10 = vector.load %arg4[%c0_9, %c0_10] : memref<32x128xf32, #tpu.memory_space<vmem>>, vector<32x128xf32>
    %cst_11 = arith.constant dense<0.000000e+00> : vector<2x128xf32>
    %11 = tpu.matmul %9, %10, %cst_11 {dimension_numbers = #tpu.dot_dimension_numbers<[1], [0], [0], [1], [0, 0, 1, 1], [], []>} : vector<2x32xf32>, vector<32x128xf32>, vector<2x128xf32> -> vector<2x128xf32>
    %c0_12 = arith.constant 0 : index
    %c0_13 = arith.constant 0 : index
    %12 = vector.load %arg5[%c0_12, %c0_13] : memref<1x128xf32, #tpu.memory_space<vmem>>, vector<1x128xf32>
    %13 = vector.broadcast %12 : vector<1x128xf32> to vector<2x128xf32>
    %14 = arith.addf %11, %13 : vector<2x128xf32>
    %c0_14 = arith.constant 0 : index
    %c0_15 = arith.constant 0 : index
    %15 = vector.load %arg6[%c0_14, %c0_15] : memref<2x128xf32, #tpu.memory_space<vmem>>, vector<2x128xf32>
    tpu.vector_store %arg6[%c0_14, %c0_15], %14 {strides = array<i32>} : memref<2x128xf32, #tpu.memory_space<vmem>>, vector<2x128xf32>,
    return
  }
}

</mosaic_0001>

<bundles_post_ra>
// kernel: model_wrapper_forward.1
= control target key start
LH: loop header
LB: loop body
LE: loop exit
PB: predicated region body
PF: predicated region fallthrough
CT: control target
= control target key end

     0   :  { %v604_v1 = vmov 0   ;;  %vm129_vm0 = vcmask 1041408   ;;  %vm122_vm1 = vcmask 293888   ;;  %v605_v23 = vmov 1983009808   ;;  %s727_s0 = inlined_call_operand.vmem [shape: bf16[36,512], index: 0, kind: input, shape index: {}]   ;;  %s728_s1 = inlined_call_operand.vmem [shape: bf16[32,36], index: 1, kind: input, shape index: {}]   ;;  %s729_s2 = inlined_call_operand.vmem [shape: f32[32,1], index: 2, kind: input, shape index: {}]   ;;  %s730_s3 = inlined_call_operand.vmem [shape: f32[2,512], index: 3, kind: input, shape index: {}]   ;;  %s731_s4 = inlined_call_operand.vmem [shape: f32[32,128], index: 4, kind: input, shape index: {}]   ;;  %s732_s5 = inlined_call_operand.vmem [shape: f32[1,128], index: 5, kind: input, shape index: {}]   ;;  %s733_s6 = inlined_call_operand.vmem [shape: f32[2,128], index: 6, kind: output, shape index: {}]  }
   0x1   :  { %v585_v0 = vld [vmem:[%s727_s0 + $0x4] ss:$16 sps:$4 sm:$0xff]   ;;  %174 = vmatprep.mubr.bf16.mxu0 %v604_v1  ;;  %227 = vmatprep.mubr.bf16.mxu1 %v604_v1  ;;  %v587_v2 = vld [vmem:[%s727_s0 + $0xc] ss:$16 sps:$4 sm:$0xff]   ;;  %v589_v3 = vld [vmem:[%s727_s0] ss:$16 sps:$4 sm:$0xff]   ;;  %v268_v24 = vunpack.c.l.s4 %v605_v23  ;;  %v270_v25 = vlaneseq }
   0x2   :  { %583 = vset.pattern.permute.xlu0 %v604_v1  ;;  %584 = vset.pattern.permute.xlu1 %v604_v1  ;;  %v590_v4 = vld [vmem:[%s727_s0 + $0x8] ss:$16 sps:$4 sm:$0xff]   ;;  %v591_v5 = vld [vmem:[%s727_s0 + $0x24] ss:$16 sps:$4 sm:$0xff]   ;;  %v593_v6 = vld [vmem:[%s727_s0 + $0x2c] ss:$16 sps:$4 sm:$0xff]  }
   0x3   :  { %142 = vmatprep.subr.bf16.mxu0 %v585_v0  ;;  %195 = vmatprep.subr.bf16.mxu1 %v587_v2  ;;  %v595_v7 = vld [vmem:[%s727_s0 + $0x20] ss:$16 sps:$4 sm:$0xff]   ;;  %v596_v8 = vld [vmem:[%s727_s0 + $0x28] ss:$16 sps:$4 sm:$0xff]   ;;  %v269_v26 = vunpack.c.0.s8 %v268_v24  ;;  %v271_v27 = vshrl.u32 %v270_v25, 7  ;;  %vm607_vm2 = vmmov 0  }
   0x4   :  { %143 = vmatpush1.bf16.msra.mxu0 %v589_v3  ;;  %196 = vmatpush1.bf16.msra.mxu1 %v590_v4  ;;  %v36_v9 = vld [vmem:[%s727_s0 + $0x40] sm:$0x33]  ;;  %v37_v10 = vld [vmem:[%s727_s0 + $0x48] sm:$0x33]  ;;  %v40_v16 = vld [vmem:[%s729_s2 + $0x10] sm:$0xff]  ;;  %vm438_vm3 = vcmask 261120  }
   0x5   :  { %144 = vmatprep.subr.bf16.mxu0 %v591_v5  ;;  %197 = vmatprep.subr.bf16.mxu1 %v593_v6  ;;  %v528_v11 = vcombine.high %v36_v9, %v36_v9  ;;  %v530_v12 = vcombine.high %v37_v10, %v37_v10  ;;  %v527_v13 = vcombine.low %v36_v9, %v36_v9  ;;  %v38_v15 = vld [vmem:[%s729_s2] sm:$0xff]  ;;  %v39_v20 = vld [vmem:[%s729_s2 + $0x8] sm:$0xff]  ;;  %v41_v21 = vld [vmem:[%s729_s2 + $0x18] sm:$0xff] }
   0x6   :  { %v529_v14 = vcombine.low %v37_v10, %v37_v10  ;;  %44 = vperm.xlu0 %583, %v38_v15   ;;  %54 = vperm.xlu1 %584, %v40_v16   ;;  %v601_v19 = vld [vmem:[%s728_s1] sm:$0xff]   ;;  %v602_v22 = vld [vmem:[%s728_s1 + $0x8] sm:$0xff]   ;;  %v272_v29 = vsub.s32 %v269_v26, %v271_v27 }
   0x7   :  { %v131_v17 = vsel %vm129_vm0, %v527_v13, 0  ;;  %v264_v28 = vld [vmem:[%s730_s3] sm:$0xff] }
   0x8   :  { %145 = vmatpush1.bf16.msra.mxu0 %v595_v7  ;;  %198 = vmatpush1.bf16.msra.mxu1 %v596_v8  ;;  %v137_v18 = vsel %vm129_vm0, %v529_v14, 0  ;;  %v266_v30 = vcombine.high %v264_v28, %v264_v28  ;;  %v699_v31 = vrot.slane %v264_v28, %v272_v29 }
   0x9   :  { %531 = vmatprep.subr.msk.bf16.mxu0 %vm129_vm0, %v528_v11  ;;  %534 = vmatprep.subr.msk.bf16.mxu1 %vm129_vm0, %v530_v12 }
   0xa   :  { %49 = vperm.xlu0 %583, %v39_v20   ;;  %59 = vperm.xlu1 %584, %v41_v21   ;;  %v701_v32 = vrot.slane %v266_v30, %v272_v29  ;;  %v281_v33 = vcombine.high %v699_v31, %v699_v31 }
   0xc   :  { %147 = vmatpush1.bf16.msra.mxu0 %v131_v17  ;;  %200 = vmatpush1.bf16.msra.mxu1 %v137_v18  ;;  %v282_v34 = vcombine.high %v701_v32, %v701_v32 }
   0xf   :  { %532 = vmatmul.mubr.msk.bf16.vlgmr.msra.gmra.mrb[0].mxu0 %vm122_vm1, %v601_v19  ;;  %535 = vmatmul.mubr.msk.bf16.vlgmr.msra.gmra.mrb[0].mxu1 %vm122_vm1, %v601_v19 }
  0x10   :  { %184 = vmatprep.mubr.bf16.mxu0 %v604_v1  ;;  %237 = vmatprep.mubr.bf16.mxu1 %v604_v1 }
  0x17   :  { %533 = vmatmul.mubr.msk.bf16.gmra.mrb[4].mxu0 %vm122_vm1, %v602_v22  ;;  %536 = vmatmul.mubr.msk.bf16.gmra.mrb[4].mxu1 %vm122_vm1, %v602_v22 }
  0x18   :  { %351 = vmatprep.mubr.f32.mxu1 %v281_v33  ;;  %421 = vmatprep.mubr.f32.mxu0 %v282_v34  ;;  %v606_v33 = vmov 0.0|0.0   ;;  %v427_v34 = vld [vmem:[%s731_s4] sm:$0xff] }
  0x85   :  { %v45_v35 = vpop.permute.xlu0 %44  ;;  %v55_v37 = vpop.permute.xlu1 %54 }
  0x89   :  { %v50_v36 = vpop.permute.xlu0 %49  ;;  %v60_v0 = vpop.permute.xlu1 %59 }
  0xe2   :  { %v176_v38 = vpop.f32.mrb[0].mxu0  ;;  %v229_v39 = vpop.f32.mrb[0].mxu1 }
  0xe3   :  { %v177_v40 = vadd.f32 %v176_v38, %v45_v35  ;;  %v230_v41 = vadd.f32 %v229_v39, %v45_v35  ;;  %v178_v42 = vpop.f32.mrb[1].mxu0  ;;  %v231_v43 = vpop.f32.mrb[1].mxu1  ;;  %v430_v38 = vld [vmem:[%s731_s4 + $0x18] sm:$0xff] }
  0xe4   :  { %v179_v44 = vadd.f32 %v178_v42, %v45_v35  ;;  %v232_v45 = vadd.f32 %v231_v43, %v45_v35  ;;  %v180_v46 = vpop.f32.mrb[2].mxu0  ;;  %v233_v47 = vpop.f32.mrb[2].mxu1  ;;  %v428_v35 = vld [vmem:[%s731_s4 + $0x8] sm:$0xff] }
  0xe5   :  { %v181_v48 = vadd.f32 %v180_v46, %v50_v36  ;;  %v234_v49 = vadd.f32 %v233_v47, %v50_v36  ;;  %v182_v50 = vpop.f32.mrb[3].mxu0  ;;  %v235_v51 = vpop.f32.mrb[3].mxu1  ;;  %v248_v54 = vmax.f32 %v177_v40, 0.0  ;;  %v250_v55 = vmax.f32 %v230_v41, 0.0 }
  0xe6   :  { %v183_v52 = vadd.f32 %v182_v50, %v50_v36  ;;  %v236_v53 = vadd.f32 %v235_v51, %v50_v36  ;;  %v249_v58 = vmax.f32 %v179_v44, 0.0  ;;  %v251_v59 = vmax.f32 %v232_v45, 0.0  ;;  %v537_v44 = vld [vmem:[%s732_s5] ss:$0 sm:$0xff] }
  0xe7   :  { %v252_v56 = vmax.f32 %v181_v48, 0.0  ;;  %v254_v57 = vmax.f32 %v234_v49, 0.0  ;;  %v572_v36 = vpack.c.bf16 %v428_v35, %v427_v34  ;;  %v608_v40 = vmov 0.0  }
  0xe8   :  { %v253_v60 = vmax.f32 %v183_v52, 0.0  ;;  %v255_v61 = vmax.f32 %v236_v53, 0.0 }
  0xe9   :  { %v557_v62 = vpack.c.bf16 %v252_v56, %v248_v54  ;;  %v565_v63 = vpack.c.bf16 %v254_v57, %v250_v55 }
  0xea   :  { %v555_v1 = vpack.c.bf16 %v253_v60, %v249_v58  ;;  %v563_v2 = vpack.c.bf16 %v255_v61, %v251_v59  ;;  %v186_v3 = vpop.f32.mrb[4].mxu0  ;;  %v239_v4 = vpop.f32.mrb[4].mxu1 }
  0xeb   :  { %v187_v5 = vadd.f32 %v186_v3, %v55_v37  ;;  %v240_v6 = vadd.f32 %v239_v4, %v55_v37  ;;  %v188_v7 = vpop.f32.mrb[5].mxu0  ;;  %v241_v8 = vpop.f32.mrb[5].mxu1 }
  0xec   :  { %v189_v9 = vadd.f32 %v188_v7, %v55_v37  ;;  %v242_v10 = vadd.f32 %v241_v8, %v55_v37  ;;  %v190_v11 = vpop.f32.mrb[6].mxu0  ;;  %v243_v12 = vpop.f32.mrb[6].mxu1  ;;  %556 = vmatprep.subr.bf16.mxu1 %v555_v1  ;;  %564 = vmatprep.subr.bf16.mxu0 %v563_v2  ;;  %v429_v37 = vld [vmem:[%s731_s4 + $0x10] sm:$0xff] }
  0xed   :  { %v191_v13 = vadd.f32 %v190_v11, %v60_v0  ;;  %v244_v14 = vadd.f32 %v243_v12, %v60_v0  ;;  %v192_v15 = vpop.f32.mrb[7].mxu0  ;;  %v245_v16 = vpop.f32.mrb[7].mxu1  ;;  %558 = vmatpush1.bf16.xpose.msra.mxu1 %v557_v62  ;;  %566 = vmatpush1.bf16.xpose.msra.mxu0 %v565_v63  ;;  %v256_v19 = vmax.f32 %v187_v5, 0.0  ;;  %v258_v20 = vmax.f32 %v240_v6, 0.0 }
  0xee   :  { %v193_v17 = vadd.f32 %v192_v15, %v60_v0  ;;  %v246_v18 = vadd.f32 %v245_v16, %v60_v0  ;;  %v257_v23 = vmax.f32 %v189_v9, 0.0  ;;  %v259_v24 = vmax.f32 %v242_v10, 0.0 }
  0xef   :  { %v260_v21 = vmax.f32 %v191_v13, 0.0  ;;  %v262_v22 = vmax.f32 %v244_v14, 0.0  ;;  %v575_v39 = vpack.c.bf16 %v430_v38, %v429_v37 }
  0xf0   :  { %v261_v25 = vmax.f32 %v193_v17, 0.0  ;;  %v263_v26 = vmax.f32 %v246_v18, 0.0 }
  0xf1   :  { %v561_v27 = vpack.c.bf16 %v260_v21, %v256_v19  ;;  %v569_v28 = vpack.c.bf16 %v262_v22, %v258_v20 }
  0xf2   :  { %v559_v29 = vpack.c.bf16 %v261_v25, %v257_v23  ;;  %v567_v30 = vpack.c.bf16 %v263_v26, %v259_v24 }
  0xf4   :  { %560 = vmatprep.subr.bf16.mxu1 %v559_v29  ;;  %568 = vmatprep.subr.bf16.mxu0 %v567_v30 }
  0xf5   :  { %562 = vmatpush1.bf16.xpose.msra.mxu1 %v561_v27  ;;  %570 = vmatpush1.bf16.xpose.msra.mxu0 %v569_v28 }
  0xf6   :  { %571 = vmatprep.subr.bf16.mxu1 %v606_v33 }
  0xfc   :  { %352 = vmatmul.mubr.f32.vlgmr.msra.gmra.mrb[8].mxu1 %v699_v31  ;;  %422 = vmatmul.mubr.f32.vlgmr.msra.gmra.mrb[8].mxu0 %v701_v32 }
  0xfd   :  { %573 = vmatpush3.bf16.msra.mxu1 %v572_v36  ;;  %552 = vmatprep.mubr.msk.f32.mxu1 %vm607_vm2, %v608_v40 }
  0xfe   :  { %574 = vmatprep.subr.bf16.mxu1 %v606_v33 }
 0x101   :  { %576 = vmatpush3.bf16.msra.mxu1 %v575_v39 }
 0x1cf   :  { %v353_v41 = vpop.f32.mrb[8].mxu1  ;;  %v423_v42 = vpop.f32.mrb[8].mxu0 }
 0x1d0   :  { %v424_v31 = vadd.f32 %v423_v42, %v353_v41  ;;  %v355_v32 = vpop.f32.mrb[9].mxu1  ;;  %v425_v43 = vpop.f32.mrb[9].mxu0 }
 0x1d2   :  { %553 = vmatmul.mubr.msk.f32.vlgmr.msra.gmra.mrb[10].mxu1 %vm438_vm3, %v424_v31 }
 0x2a5   :  { %v508_v45 = vpop.f32.mrb[10].mxu1 }
 0x2a6   :  { %v509_v46 = vadd.f32 %v537_v44, %v508_v45  ;;  %v554_v47 = vpop.f32.mrb[11].mxu1 }
 0x2a8   :  { %512 = vst [vmem:[%s733_s6] sm:$0x3] %v509_v46 }

</bundles_post_ra>
